<compile_context>
chip_gen: v5e
topology: v5e:2x2
jax: 0.10.0
libtpu: 0.0.40
codegen_flags: <defaults>
</compile_context>

<pallas_src>
import jax
import jax.numpy as jnp
from jax.experimental import pallas as pl
from jax.experimental.pallas import tpu as pltpu


def _decoder_kernel(
    emb_ref, q_ref, k_ref,                       # activations
    wq_aT_ref, wk_aT_ref, b_a_ref, v_a_ref,      # attention params (pre-transposed)
    w_lstmT_ref, b_lstm_ref,                     # fused LSTM params (pre-transposed)
    w_outT_ref, b_o_ref,                         # fused f_out params (pre-transposed, V padded)
    pred_ref,                                    # output [B, Vp]
):
    emb = emb_ref[...]            # [B, E]
    q = q_ref[...]                # [B, D]
    k = k_ref[...]                # [B, S, H]
    B, S, H = k.shape
    D = q.shape[-1]

    # ---- additive attention + context (batched over B*S, single MXU pass) ----
    k2d = k.reshape(B * S, H)                                                   # no-op view
    k_proj = jnp.dot(k2d, wk_aT_ref[...],
                     preferred_element_type=jnp.float32).reshape(B, S, D)       # [B, S, D]
    q_proj = jnp.dot(q, wq_aT_ref[...], preferred_element_type=jnp.float32)     # [B, D]
    energy = jnp.tanh(k_proj + q_proj[:, None, :] + b_a_ref[...][None])         # [B, S, D]
    scores = jnp.sum(energy * v_a_ref[...][None], axis=-1)                      # [B, S]
    scores = scores - jnp.max(scores, axis=1, keepdims=True)
    e = jnp.exp(scores)
    inv_den = pl.reciprocal(jnp.sum(e, axis=1, keepdims=True), approx=True)     # EUP
    attn = e * inv_den                                                          # [B, S]
    c = jnp.sum(attn[:, :, None] * k, axis=1)                                   # [B, H]

    # ---- single-step LSTM: x = cat(emb, c), h = q; one fused matmul ----
    x = jnp.concatenate([emb, c, q], axis=-1)                                   # [B, E+H+D]
    gates = (jnp.dot(x, w_lstmT_ref[...], preferred_element_type=jnp.float32)
             + b_lstm_ref[...])                                                 # [B, 4D]
    i_g = jax.nn.sigmoid(gates[:, 0 * D:1 * D])
    f_g = jax.nn.sigmoid(gates[:, 1 * D:2 * D])
    g_g = jnp.tanh(gates[:, 2 * D:3 * D])
    o_g = jax.nn.sigmoid(gates[:, 3 * D:4 * D])
    c_n = f_g * q + i_g * g_g
    h_n = o_g * jnp.tanh(c_n)                                                   # [B, D]

    # ---- prediction = f_out(cat(h_n, c, emb)); one fused matmul, lane-dense store ----
    y = jnp.concatenate([h_n, c, emb], axis=-1)                                 # [B, D+H+E]
    pred = (jnp.dot(y, w_outT_ref[...], preferred_element_type=jnp.float32)
            + b_o_ref[...])                                                     # [B, Vp]
    pred_ref[...] = pred.astype(pred_ref.dtype)


def pack_params(p, lane=128):
    """One-time host-side packing: fuse the cat-split weights, transpose to
    [in_features, out_features], zero-pad the vocab dim to a multiple of 128."""
    V = p["wo_h"].shape[0]
    Vp = ((V + lane - 1) // lane) * lane
    w_lstmT = jnp.concatenate([p["wih_e"], p["wih_c"], p["whh"]], axis=1).T     # [E+H+D, 4D]
    w_out = jnp.concatenate([p["wo_h"], p["wo_c"], p["wo_e"]], axis=1)          # [V, D+H+E]
    w_outT = jnp.pad(w_out.T, ((0, 0), (0, Vp - V)))                            # [D+H+E, Vp]
    b_o = jnp.pad(p["b_o"], ((0, 0), (0, Vp - V)))                              # [1, Vp]
    return {
        "emb_matrix": p["emb_matrix"],
        "wq_aT": p["wq_a"].T, "wk_aT": p["wk_a"].T,
        "b_a": p["b_a"], "v_a": p["v_a"],
        "w_lstmT": w_lstmT, "b_lstm": p["b_lstm"],
        "w_outT": w_outT, "b_o": b_o,
        "V": V,
    }


def decoder_forward(decoder_input, q, k, pp):
    """JAX wrapper: embedding gather (glue) + fused Pallas decoder step."""
    # TODO(synk): fold this gather into the kernel via PrefetchScalarGridSpec + pl.Element
    # row-gather on emb_matrix to drop one XLA op / HBM round-trip per decode step.
    emb = pp["emb_matrix"][decoder_input]                   # [B, E]; dropout = eval identity
    B = q.shape[0]
    Vp = pp["w_outT"].shape[1]
    inputs = (
        emb, q, k,
        pp["wq_aT"], pp["wk_aT"], pp["b_a"], pp["v_a"],
        pp["w_lstmT"], pp["b_lstm"],
        pp["w_outT"], pp["b_o"],
    )
    pred_padded = pl.pallas_call(
        _decoder_kernel,
        out_shape=jax.ShapeDtypeStruct((B, Vp), jnp.float32),
        in_specs=[pl.BlockSpec(memory_space=pltpu.MemorySpace.VMEM)] * len(inputs),
        out_specs=pl.BlockSpec(memory_space=pltpu.MemorySpace.VMEM),
    )(*inputs)
    return pred_padded[:, :pp["V"]]                          # drop lane padding


def reference_forward(decoder_input, q, k, p):
    """Pure-JAX reference of the same math (exact divide softmax)."""
    emb = p["emb_matrix"][decoder_input]
    energy = jnp.tanh(jnp.einsum("bsh,dh->bsd", k, p["wk_a"])
                      + (q @ p["wq_a"].T)[:, None, :] + p["b_a"][None])
    scores = jnp.sum(energy * p["v_a"][None], axis=-1)
    a = jax.nn.softmax(scores, axis=-1)
    c = jnp.einsum("bs,bsh->bh", a, k)
    gates = emb @ p["wih_e"].T + c @ p["wih_c"].T + q @ p["whh"].T + p["b_lstm"]
    D = q.shape[-1]
    i_g = jax.nn.sigmoid(gates[:, :D])
    f_g = jax.nn.sigmoid(gates[:, D:2 * D])
    g_g = jnp.tanh(gates[:, 2 * D:3 * D])
    o_g = jax.nn.sigmoid(gates[:, 3 * D:])
    c_n = f_g * q + i_g * g_g
    h_n = o_g * jnp.tanh(c_n)
    return h_n @ p["wo_h"].T + c @ p["wo_c"].T + emb @ p["wo_e"].T + p["b_o"]


if __name__ == "__main__":
    # small config consistent with the module
    B, S = 2, 8              # batch, src_len
    H = 32                   # config.hidden_dim   (encoder output dim)
    E = 16                   # config.char_dim     (embedding dim)
    D = 32                   # config.dec_hid_dim
    V = 40                   # out_dim
    VOCAB = 50

    key = jax.random.PRNGKey(0)
    ks = jax.random.split(key, 16)

    def init(k_, shape, scale=0.1):
        return (scale * jax.random.normal(k_, shape)).astype(jnp.float32)

    params = {
        "emb_matrix": init(ks[0], (VOCAB, E)),
        # attention Linear(H+D -> D) split into q-part / k-part (cat order is (q, k))
        "wq_a": init(ks[1], (D, D)),
        "wk_a": init(ks[2], (D, H)),
        "b_a":  init(ks[3], (1, D)),
        "v_a":  init(ks[4], (1, D)),            # Linear(D, 1, bias=False) weight
        # LSTM(E+H -> D): W_ih split into emb-part / context-part; b = b_ih + b_hh
        "wih_e": init(ks[5], (4 * D, E)),
        "wih_c": init(ks[6], (4 * D, H)),
        "whh":   init(ks[7], (4 * D, D)),
        "b_lstm": init(ks[8], (1, 4 * D)),
        # f_out Linear(D+H+E -> V) split by the cat(h, c, emb) pieces
        "wo_h": init(ks[9], (V, D)),
        "wo_c": init(ks[10], (V, H)),
        "wo_e": init(ks[11], (V, E)),
        "b_o":  init(ks[12], (1, V)),
    }

    decoder_input = jax.random.randint(ks[13], (B,), 0, VOCAB, dtype=jnp.int32)
    q = init(ks[14], (B, D), scale=0.5)
    k = init(ks[15], (B, S, H), scale=0.5)

    packed = pack_params(params)
    pred = jax.block_until_ready(decoder_forward(decoder_input, q, k, packed))
    ref = jax.block_until_ready(reference_forward(decoder_input, q, k, params))

    assert pred.shape == (B, V)
    # approx-reciprocal softmax -> slightly looser tolerance than exact divide
    assert jnp.allclose(pred, ref, atol=2e-3, rtol=2e-3), "mismatch vs reference"
    print("KERNEL_OK")
</pallas_src>

<mosaic_0001>
module attributes {stable_mosaic.version = 11 : i64} {
  func.func @_decoder_kernel(%arg0: memref<2x16xf32, #tpu.memory_space<vmem>>, %arg1: memref<2x32xf32, #tpu.memory_space<vmem>>, %arg2: memref<2x8x32xf32, #tpu.memory_space<vmem>>, %arg3: memref<32x32xf32, #tpu.memory_space<vmem>>, %arg4: memref<32x32xf32, #tpu.memory_space<vmem>>, %arg5: memref<1x32xf32, #tpu.memory_space<vmem>>, %arg6: memref<1x32xf32, #tpu.memory_space<vmem>>, %arg7: memref<80x128xf32, #tpu.memory_space<vmem>>, %arg8: memref<1x128xf32, #tpu.memory_space<vmem>>, %arg9: memref<80x128xf32, #tpu.memory_space<vmem>>, %arg10: memref<1x128xf32, #tpu.memory_space<vmem>>, %arg11: memref<2x128xf32, #tpu.memory_space<vmem>>) attributes {dimension_semantics = [], scalar_prefetch = 0 : i64, scratch_operands = 0 : i64, tpu.core_type = #tpu.core_type<tc>} {
    %c0 = arith.constant 0 : index
    %c0_0 = arith.constant 0 : index
    %0 = vector.load %arg0[%c0, %c0_0] : memref<2x16xf32, #tpu.memory_space<vmem>>, vector<2x16xf32>
    %c0_1 = arith.constant 0 : index
    %c0_2 = arith.constant 0 : index
    %1 = vector.load %arg1[%c0_1, %c0_2] : memref<2x32xf32, #tpu.memory_space<vmem>>, vector<2x32xf32>
    %c0_3 = arith.constant 0 : index
    %c0_4 = arith.constant 0 : index
    %c0_5 = arith.constant 0 : index
    %2 = vector.load %arg2[%c0_3, %c0_4, %c0_5] : memref<2x8x32xf32, #tpu.memory_space<vmem>>, vector<2x8x32xf32>
    %3 = vector.shape_cast %2 : vector<2x8x32xf32> to vector<16x32xf32>
    %c0_6 = arith.constant 0 : index
    %c0_7 = arith.constant 0 : index
    %4 = vector.load %arg4[%c0_6, %c0_7] : memref<32x32xf32, #tpu.memory_space<vmem>>, vector<32x32xf32>
    %cst = arith.constant dense<0.000000e+00> : vector<16x32xf32>
    %5 = tpu.matmul %3, %4, %cst {dimension_numbers = #tpu.dot_dimension_numbers<[1], [0], [0], [1], [0, 0, 1, 1], [], []>} : vector<16x32xf32>, vector<32x32xf32>, vector<16x32xf32> -> vector<16x32xf32>
    %6 = vector.shape_cast %5 : vector<16x32xf32> to vector<2x8x32xf32>
    %c0_8 = arith.constant 0 : index
    %c0_9 = arith.constant 0 : index
    %7 = vector.load %arg3[%c0_8, %c0_9] : memref<32x32xf32, #tpu.memory_space<vmem>>, vector<32x32xf32>
    %cst_10 = arith.constant dense<0.000000e+00> : vector<2x32xf32>
    %8 = tpu.matmul %1, %7, %cst_10 {dimension_numbers = #tpu.dot_dimension_numbers<[1], [0], [0], [1], [0, 0, 1, 1], [], []>} : vector<2x32xf32>, vector<32x32xf32>, vector<2x32xf32> -> vector<2x32xf32>
    %9 = vector.shape_cast %8 : vector<2x32xf32> to vector<2x1x32xf32>
    %10 = vector.broadcast %9 : vector<2x1x32xf32> to vector<2x8x32xf32>
    %11 = arith.addf %6, %10 : vector<2x8x32xf32>
    %c0_11 = arith.constant 0 : index
    %c0_12 = arith.constant 0 : index
    %12 = vector.load %arg5[%c0_11, %c0_12] : memref<1x32xf32, #tpu.memory_space<vmem>>, vector<1x32xf32>
    %13 = vector.shape_cast %12 : vector<1x32xf32> to vector<1x1x32xf32>
    %14 = vector.broadcast %13 : vector<1x1x32xf32> to vector<2x8x32xf32>
    %15 = arith.addf %11, %14 : vector<2x8x32xf32>
    %16 = math.tanh %15 : vector<2x8x32xf32>
    %c0_13 = arith.constant 0 : index
    %c0_14 = arith.constant 0 : index
    %17 = vector.load %arg6[%c0_13, %c0_14] : memref<1x32xf32, #tpu.memory_space<vmem>>, vector<1x32xf32>
    %18 = vector.shape_cast %17 : vector<1x32xf32> to vector<1x1x32xf32>
    %19 = vector.broadcast %18 : vector<1x1x32xf32> to vector<2x8x32xf32>
    %20 = arith.mulf %16, %19 : vector<2x8x32xf32>
    %cst_15 = arith.constant dense<0.000000e+00> : vector<2x8xf32>
    %21 = vector.multi_reduction <add>, %20, %cst_15 [2] : vector<2x8x32xf32> to vector<2x8xf32>
    %cst_16 = arith.constant dense<0xFF800000> : vector<2xf32>
    %22 = vector.multi_reduction <maximumf>, %21, %cst_16 [1] : vector<2x8xf32> to vector<2xf32>
    %23 = vector.shape_cast %22 : vector<2xf32> to vector<2x1xf32>
    %24 = vector.broadcast %23 : vector<2x1xf32> to vector<2x8xf32>
    %25 = arith.subf %21, %24 : vector<2x8xf32>
    %26 = math.exp %25 : vector<2x8xf32>
    %cst_17 = arith.constant dense<0.000000e+00> : vector<2xf32>
    %27 = vector.multi_reduction <add>, %26, %cst_17 [1] : vector<2x8xf32> to vector<2xf32>
    %28 = vector.shape_cast %27 : vector<2xf32> to vector<2x1xf32>
    %29 = tpu.reciprocal %28 {approx = true} : vector<2x1xf32> -> vector<2x1xf32>
    %30 = vector.broadcast %29 : vector<2x1xf32> to vector<2x8xf32>
    %31 = arith.mulf %26, %30 : vector<2x8xf32>
    %32 = vector.shape_cast %31 : vector<2x8xf32> to vector<2x8x1xf32>
    %33 = vector.broadcast %32 : vector<2x8x1xf32> to vector<2x8x32xf32>
    %34 = arith.mulf %33, %2 : vector<2x8x32xf32>
    %cst_18 = arith.constant dense<0.000000e+00> : vector<2x32xf32>
    %35 = vector.multi_reduction <add>, %34, %cst_18 [1] : vector<2x8x32xf32> to vector<2x32xf32>
    %36 = tpu.concatenate %0, %35, %1 in 1 : vector<2x16xf32>, vector<2x32xf32>, vector<2x32xf32> -> vector<2x80xf32>
    %c0_19 = arith.constant 0 : index
    %c0_20 = arith.constant 0 : index
    %37 = vector.load %arg7[%c0_19, %c0_20] : memref<80x128xf32, #tpu.memory_space<vmem>>, vector<80x128xf32>
    %cst_21 = arith.constant dense<0.000000e+00> : vector<2x128xf32>
    %38 = tpu.matmul %36, %37, %cst_21 {dimension_numbers = #tpu.dot_dimension_numbers<[1], [0], [0], [1], [0, 0, 1, 1], [], []>} : vector<2x80xf32>, vector<80x128xf32>, vector<2x128xf32> -> vector<2x128xf32>
    %c0_22 = arith.constant 0 : index
    %c0_23 = arith.constant 0 : index
    %39 = vector.load %arg8[%c0_22, %c0_23] : memref<1x128xf32, #tpu.memory_space<vmem>>, vector<1x128xf32>
    %40 = vector.broadcast %39 : vector<1x128xf32> to vector<2x128xf32>
    %41 = arith.addf %38, %40 : vector<2x128xf32>
    %42 = vector.extract_strided_slice %41 {offsets = [0, 0], sizes = [2, 32], strides = [1, 1]} : vector<2x128xf32> to vector<2x32xf32>
    %43 = arith.negf %42 : vector<2x32xf32>
    %44 = math.exp %43 : vector<2x32xf32>
    %cst_24 = arith.constant 1.000000e+00 : f32
    %45 = vector.broadcast %cst_24 : f32 to vector<2x32xf32>
    %46 = arith.addf %45, %44 : vector<2x32xf32>
    %47 = arith.divf %45, %46 : vector<2x32xf32>
    %48 = vector.extract_strided_slice %41 {offsets = [0, 32], sizes = [2, 32], strides = [1, 1]} : vector<2x128xf32> to vector<2x32xf32>
    %49 = arith.negf %48 : vector<2x32xf32>
    %50 = math.exp %49 : vector<2x32xf32>
    %cst_25 = arith.constant 1.000000e+00 : f32
    %51 = vector.broadcast %cst_25 : f32 to vector<2x32xf32>
    %52 = arith.addf %51, %50 : vector<2x32xf32>
    %53 = arith.divf %51, %52 : vector<2x32xf32>
    %54 = vector.extract_strided_slice %41 {offsets = [0, 64], sizes = [2, 32], strides = [1, 1]} : vector<2x128xf32> to vector<2x32xf32>
    %55 = math.tanh %54 : vector<2x32xf32>
    %56 = vector.extract_strided_slice %41 {offsets = [0, 96], sizes = [2, 32], strides = [1, 1]} : vector<2x128xf32> to vector<2x32xf32>
    %57 = arith.negf %56 : vector<2x32xf32>
    %58 = math.exp %57 : vector<2x32xf32>
    %cst_26 = arith.constant 1.000000e+00 : f32
    %59 = vector.broadcast %cst_26 : f32 to vector<2x32xf32>
    %60 = arith.addf %59, %58 : vector<2x32xf32>
    %61 = arith.divf %59, %60 : vector<2x32xf32>
    %62 = arith.mulf %53, %1 : vector<2x32xf32>
    %63 = arith.mulf %47, %55 : vector<2x32xf32>
    %64 = arith.addf %62, %63 : vector<2x32xf32>
    %65 = math.tanh %64 : vector<2x32xf32>
    %66 = arith.mulf %61, %65 : vector<2x32xf32>
    %67 = tpu.concatenate %66, %35, %0 in 1 : vector<2x32xf32>, vector<2x32xf32>, vector<2x16xf32> -> vector<2x80xf32>
    %c0_27 = arith.constant 0 : index
    %c0_28 = arith.constant 0 : index
    %68 = vector.load %arg9[%c0_27, %c0_28] : memref<80x128xf32, #tpu.memory_space<vmem>>, vector<80x128xf32>
    %cst_29 = arith.constant dense<0.000000e+00> : vector<2x128xf32>
    %69 = tpu.matmul %67, %68, %cst_29 {dimension_numbers = #tpu.dot_dimension_numbers<[1], [0], [0], [1], [0, 0, 1, 1], [], []>} : vector<2x80xf32>, vector<80x128xf32>, vector<2x128xf32> -> vector<2x128xf32>
    %c0_30 = arith.constant 0 : index
    %c0_31 = arith.constant 0 : index
    %70 = vector.load %arg10[%c0_30, %c0_31] : memref<1x128xf32, #tpu.memory_space<vmem>>, vector<1x128xf32>
    %71 = vector.broadcast %70 : vector<1x128xf32> to vector<2x128xf32>
    %72 = arith.addf %69, %71 : vector<2x128xf32>
    %c0_32 = arith.constant 0 : index
    %c0_33 = arith.constant 0 : index
    %73 = vector.load %arg11[%c0_32, %c0_33] : memref<2x128xf32, #tpu.memory_space<vmem>>, vector<2x128xf32>
    tpu.vector_store %arg11[%c0_32, %c0_33], %72 {strides = array<i32>} : memref<2x128xf32, #tpu.memory_space<vmem>>, vector<2x128xf32>,
    return
  }
}

</mosaic_0001>

<bundles_post_ra>
// kernel: tpu_custom_call.1
= control target key start
LH: loop header
LB: loop body
LE: loop exit
PB: predicated region body
PF: predicated region fallthrough
CT: control target
= control target key end

     0   :  { %16 = vsyncpa [#allocation3], 0  ;;  %s882_s0 = inlined_call_operand.hbm [shape: f32[2,16], index: 0, kind: input, shape index: {}]   ;;  %s883_s1 = inlined_call_operand.hbm [shape: f32[2,32], index: 1, kind: input, shape index: {}]   ;;  %s884_s2 = inlined_call_operand.hbm [shape: f32[2,8,32], index: 2, kind: input, shape index: {}]   ;;  %s885_s3 = inlined_call_operand.hbm [shape: f32[32,32], index: 3, kind: input, shape index: {}]   ;;  %s886_s4 = inlined_call_operand.hbm [shape: f32[32,32], index: 4, kind: input, shape index: {}]   ;;  %s887_s5 = inlined_call_operand.vmem [shape: f32[1,32], index: 5, kind: input, shape index: {}]   ;;  %s888_s6 = inlined_call_operand.vmem [shape: f32[1,32], index: 6, kind: input, shape index: {}]   ;;  %s889_s7 = inlined_call_operand.hbm [shape: f32[80,128], index: 7, kind: input, shape index: {}]   ;;  %s890_s8 = inlined_call_operand.vmem [shape: f32[1,128], index: 8, kind: input, shape index: {}]   ;;  %s891_s9 = inlined_call_operand.hbm [shape: f32[80,128], index: 9, kind: input, shape index: {}]   ;;  %s892_s10 = inlined_call_operand.vmem [shape: f32[1,128], index: 10, kind: input, shape index: {}]   ;;  %s893_s11 = inlined_call_operand.hbm [shape: f32[2,128], index: 11, kind: output, shape index: {}]  }
   0x1   :  { %17 = vsyncpa [#allocation6], 0 }
   0x2   :  { %18 = vsyncpa [#allocation9], 0 }
   0x3   :  { %19 = vsyncpa [#allocation12], 0  ;;  %s37_s19 = sshll.u32 %s883_s1, 4  ;;  %s38_s19 = int_to_ptr.hbm [resolvable:$true] %s37_s19 }
   0x4   :  { %20 = vsyncpa [#allocation4], 0  ;;  %s721_s20 = smov [#allocation5]   ;;  %s60_s24 = sshll.u32 %s885_s3, 4  ;;  %s61_s24 = int_to_ptr.hbm [resolvable:$true] %s60_s24 }
   0x5   :  { %s39_s21 = sshll.u32 %s721_s20, 4  ;;  %s722_s25 = smov [#allocation8]   ;;  %s40_s21 = int_to_ptr.vmem [resolvable:$true] %s39_s21 }
   0x6   :  { %42 = dma.hbm_to_vmem [thread:$0]  %s38_s19, 32, %s40_s21, [#allocation6]  }
   0x7   :  { %s62_s26 = sshll.u32 %s722_s25, 4  ;;  %s90_s29 = sshll.u32 %s889_s7, 4  ;;  %s63_s26 = int_to_ptr.vmem [resolvable:$true] %s62_s26  ;;  %s91_s29 = int_to_ptr.hbm [resolvable:$true] %s90_s29 }
   0x8   :  { %s723_s1 = smov 128   ;;  %s724_s30 = smov 8  }
   0x9   :  { %68 = dma.hbm_to_vmem [thread:$0]  %s61_s24, 512, %s63_s26, [#allocation9], %s723_s1, %s723_s1, %s724_s30  }
   0xa   :  { %s26_s14 = sshll.u32 %s882_s0, 4  ;;  %s725_s3 = smov [#allocation11]   ;;  %s27_s14 = int_to_ptr.hbm [resolvable:$true] %s26_s14 }
   0xb   :  { %s92_s15 = sshll.u32 %s725_s3, 4  ;;  %s726_s7 = smov [#allocation2]   ;;  %s93_s15 = int_to_ptr.vmem [resolvable:$true] %s92_s15 }
   0xc   :  { %98 = dma.hbm_to_vmem [thread:$0]  %s91_s29, 1280, %s93_s15, [#allocation12], %s723_s1, %s723_s1, %s724_s30  }
   0xd   :  { %s28_s16 = sshll.u32 %s726_s7, 4  ;;  %s47_s19 = sshll.u32 %s884_s2, 4  ;;  %s29_s16 = int_to_ptr.vmem [resolvable:$true] %s28_s16  ;;  %s48_s19 = int_to_ptr.hbm [resolvable:$true] %s47_s19 }
   0xe   :  { %31 = dma.hbm_to_vmem [thread:$0]  %s27_s14, 32, %s29_s16, [#allocation3]  }
   0xf   :  { %s73_s0 = sshll.u32 %s886_s4, 4  ;;  %s727_s22 = smov [#allocation7]   ;;  %s74_s0 = int_to_ptr.hbm [resolvable:$true] %s73_s0 }
  0x10   :  { %s49_s23 = sshll.u32 %s727_s22, 4  ;;  %s728_s24 = smov [#allocation10]   ;;  %s50_s23 = int_to_ptr.vmem [resolvable:$true] %s49_s23 }
  0x11   :  { %55 = dma.hbm_to_vmem [thread:$0]  %s48_s19, 256, %s50_s23, [#allocation6], %s723_s1, %s723_s1, %s724_s30  }
  0x12   :  { %s75_s25 = sshll.u32 %s728_s24, 4  ;;  %s105_s2 = sshll.u32 %s891_s9, 4  ;;  %s76_s25 = int_to_ptr.vmem [resolvable:$true] %s75_s25  ;;  %s106_s2 = int_to_ptr.hbm [resolvable:$true] %s105_s2 }
  0x13   :  { %81 = dma.hbm_to_vmem [thread:$0]  %s74_s0, 512, %s76_s25, [#allocation9], %s723_s1, %s723_s1, %s724_s30  }
  0x14   :  { %s729_s4 = smov [#allocation13]  }
  0x15   :  { %s107_s28 = sshll.u32 %s729_s4, 4  ;;  %s108_s28 = int_to_ptr.vmem [resolvable:$true] %s107_s28 }
  0x16   :  { %113 = dma.hbm_to_vmem [thread:$0]  %s106_s2, 1280, %s108_s28, [#allocation12], %s723_s1, %s723_s1, %s724_s30  }
  0x17   :  { %711 = dma.done.wait [#allocation3], 32  }
  0x18   :  { %712 = vsyncadd [#allocation3], 4294967264 }
  0x19   :  { %713 = dma.done.wait [#allocation6], 288  }
  0x1a   :  { %714 = vsyncadd [#allocation6], 4294967008 }
  0x1b   :  { %715 = dma.done.wait [#allocation9], 1024  }
  0x1c   :  { %716 = vsyncadd [#allocation9], 4294966272 }
  0x1d   :  { %717 = dma.done.wait [#allocation12], 2560  }
  0x1e   :  { %718 = vsyncadd [#allocation12], 4294964736  ;;  %v151_v0 = vld [vmem:[#allocation10 + $0x18] sm:$0xff]  ;;  %v150_v2 = vld [vmem:[#allocation10 + $0x10] sm:$0xff]  ;;  %vm152_vm0 = vcmask 261120   ;;  %v239_v30 = vlaneseq  ;;  %vm243_vm1 = vcmask 1041409  }
  0x1f   :  { %v185_v1 = vld [vmem:[#allocation8 + $0x18] sm:$0xff]  ;;  %171 = vmatpush.msra.mxu0 %v151_v0  ;;  %v184_v3 = vld [vmem:[#allocation8 + $0x10] sm:$0xff]  ;;  %v149_v4 = vld [vmem:[#allocation10 + $0x8] sm:$0xff]  ;;  %vm246_vm2 = vcmask 58368   ;;  %v730_v37 = vmov 0   ;;  %s733_s12 = smov 48  }
  0x20   :  { %201 = vmatpush.msra.mxu1 %v185_v1  ;;  %v183_v5 = vld [vmem:[#allocation8 + $0x8] sm:$0xff]  ;;  %v148_v6 = vld [vmem:[#allocation10] sm:$0xff]  ;;  %v832_v8 = vld [vmem:[#allocation7] sm:$0xff]  ;;  %v240_v31 = vand.u32 127, %v239_v30  ;;  %495 = vset.pattern.permute.xlu2 %v730_v37  ;;  %vm319_vm3 = vcmask 130048   ;;  %vm321_vm4 = vcmask 392192  }
  0x21   :  { %172 = vmatpush.msra.mxu0 %v150_v2  ;;  %v182_v7 = vld [vmem:[#allocation8] sm:$0xff]  ;;  %v834_v9 = vld [vmem:[#allocation5] sm:$0x3]  ;;  %v840_v10 = vld [vmem:[#allocation7 + $0x8] sm:$0xff]  ;;  %494 = vset.pattern.permute.xlu1 %v730_v37  ;;  %vm337_vm5 = vcmask 654336   ;;  %s734_s3 = smov 64  }
  0x22   :  { %202 = vmatpush.msra.mxu1 %v184_v3  ;;  %v497_v14 = vld [vmem:[%s887_s5] ss:$0 sm:$0xff]  ;;  %496 = vset.pattern.permute.xlu0 %v730_v37  ;;  %v331_v60 = vld [vmem:[#allocation11 + $0x40] sm:$0xff]  ;;  %v330_v61 = vld [vmem:[#allocation11 + $0x38] sm:$0xff]  ;;  %s731_s5 = smov 32   ;;  %vm413_vm10 = vcmask 523264  }
  0x23   :  { %173 = vmatpush.msra.mxu0 %v149_v4  ;;  %v498_v21 = vld [vmem:[%s888_s6] ss:$0 sm:$0xff]  ;;  %v329_v62 = vld [vmem:[#allocation11 + $0x30] sm:$0xff]  ;;  %s732_s6 = smov 16   ;;  %s735_s7 = smov [#allocation14]  }
  0x24   :  { %203 = vmatpush.msra.mxu1 %v183_v5  ;;  %v332_v59 = vld [vmem:[#allocation11 + $0x48] sm:$0xff]  ;;  %s458_s16 = sshll.u32 %s735_s7, 4  ;;  %s460_s19 = sshll.u32 %s893_s11, 4  ;;  %s459_s16 = int_to_ptr.vmem [resolvable:$true] %s458_s16  ;;  %s461_s19 = int_to_ptr.hbm [resolvable:$true] %s460_s19 }
  0x25   :  { %174 = vmatpush.msra.mxu0 %v148_v6  ;;  %347 = vmatpush.msra.mxu2 %v332_v59  ;;  %v328_v63 = vld [vmem:[#allocation11 + $0x28] sm:$0xff] }
  0x26   :  { %204 = vmatpush.msra.mxu1 %v182_v7  ;;  %473 = vmatmul.msk.f32.vlgmr.msra.gmra.mxu0 %vm152_vm0, %v832_v8 }
  0x27   :  { %475 = vmatmul.msk.f32.vlgmr.msra.gmra.mxu1 %vm152_vm0, %v834_v9  ;;  %348 = vmatpush.msra.mxu2 %v331_v60  ;;  %v419_v60 = vld [vmem:[#allocation13 + $0x20] sm:$0xff] }
  0x29   :  { %349 = vmatpush.msra.mxu2 %v330_v61  ;;  %v418_v61 = vld [vmem:[#allocation13 + $0x18] sm:$0xff] }
  0x2b   :  { %350 = vmatpush.msra.mxu2 %v329_v62  ;;  %v417_v62 = vld [vmem:[#allocation13 + $0x10] sm:$0xff] }
  0x2d   :  { %351 = vmatpush.msra.mxu2 %v328_v63  ;;  %v416_v63 = vld [vmem:[#allocation13 + $0x8] sm:$0xff] }
  0x2e   :  { %474 = vmatmul.msk.f32.gmra.mxu0 %vm152_vm0, %v840_v10 }
  0xa3   :  { %v176_v11 = vpop.f32.mrf.mxu0 }
  0xa4   :  { %v206_v12 = vpop.f32.mrf.mxu1 }
  0xa5   :  { %v211_v13 = vperm.slane %v206_v12, 0  ;;  %v210_v15 = vrot.slane %v206_v12, 1 }
  0xa7   :  { %v215_v16 = vadd.f32 %v211_v13, %v176_v11  ;;  %v212_v18 = vperm.slane %v210_v15, 0 }
  0xa9   :  { %v221_v17 = vadd.f32 %v497_v14, %v215_v16 }
  0xab   :  { %501 = vtanh.f32 %v221_v17  ;;  %v179_v19 = vpop.f32.mrf.mxu0 }
  0xac   :  { %v216_v20 = vadd.f32 %v212_v18, %v179_v19 }
  0xae   :  { %v222_v22 = vadd.f32 %v497_v14, %v216_v20 }
  0xb0   :  { %503 = vtanh.f32 %v222_v22  ;;  %v325_v22 = vld [vmem:[#allocation11 + $0x10] sm:$0xff] }
  0xb1   :  { %v502_v23 = vpop.eup %501 }
  0xb2   :  { %v229_v24 = vmul.f32 %v502_v23, %v498_v21  ;;  %v324_v23 = vld [vmem:[#allocation11 + $0x8] sm:$0xff] }
  0xb4   :  { %v231_v25 = vsel %vm152_vm0, %v229_v24, 0.0  ;;  %v323_v24 = vld [vmem:[#allocation11] sm:$0xff] }
  0xb5   :  { %232 = vadd.xlane.f32.xlu0 %v231_v25 }
  0xb6   :  { %v504_v26 = vpop.eup %503 }
  0xb7   :  { %v230_v27 = vmul.f32 %v504_v26, %v498_v21  ;;  %v326_v21 = vld [vmem:[#allocation11 + $0x18] sm:$0xff]  ;;  %v144_v26 = vld [vmem:[#allocation2] sm:$0x3] }
  0xb9   :  { %v234_v28 = vsel %vm152_vm0, %v230_v27, 0.0 }
  0xbd   :  { %235 = vadd.xlane.f32.xlu0 %v234_v28 }
 0x128   :  { %v233_v29 = vpop.xlane.xlu0 %232 }
 0x129   :  { %v241_v33 = vperm.slane %v233_v29, %v240_v31 }
 0x130   :  { %v236_v32 = vpop.xlane.xlu0 %235 }
 0x131   :  { %v242_v34 = vperm.slane %v236_v32, %v240_v31 }
 0x133   :  { %v244_v35 = vsel %vm243_vm1, %v242_v34, %v241_v33 }
 0x134   :  { %v247_v36 = vsel %vm246_vm2, %v244_v35, -inf }
 0x135   :  { %248 = vmax.xlane.f32.xlu1 %v247_v36 }
 0x1a8   :  { %v249_v38 = vpop.xlane.xlu1 %248 }
 0x1a9   :  { %v251_v39 = vperm.slane %v249_v38, 0  ;;  %v252_v40 = vperm.slane %v249_v38, 1 }
 0x1ab   :  { %v255_v41 = vsub.f32 %v233_v29, %v251_v39  ;;  %v256_v42 = vsub.f32 %v236_v32, %v252_v40 }
 0x1ad   :  { %v257_v43 = vmul.f32 1.442695, %v255_v41  ;;  %v259_v44 = vmul.f32 1.442695, %v256_v42 }
 0x1af   :  { %505 = vpow2.f32 %v257_v43 }
 0x1b0   :  { %507 = vpow2.f32 %v259_v44 }
 0x1b5   :  { %v506_v45 = vpop.eup %505 }
 0x1b6   :  { %v508_v46 = vpop.eup %507  ;;  %264 = vperm.xlu1 %494, %v506_v45  }
 0x1b7   :  { %267 = vperm.xlu2 %495, %v508_v46  }
 0x211   :  { %v268_v47 = vpop.permute.xlu2 %267 }
 0x212   :  { %v270_v49 = vperm.slane %v268_v47, %v240_v31 }
 0x228   :  { %v265_v48 = vpop.permute.xlu1 %264 }
 0x229   :  { %v269_v50 = vperm.slane %v265_v48, %v240_v31 }
 0x22b   :  { %v271_v51 = vsel %vm243_vm1, %v270_v49, %v269_v50 }
 0x22c   :  { %v273_v52 = vsel %vm246_vm2, %v271_v51, 0.0 }
 0x22d   :  { %274 = vadd.xlane.f32.xlu2 %v273_v52 }
 0x2a0   :  { %v275_v53 = vpop.xlane.xlu2 %274 }
 0x2a1   :  { %509 = vrcp.f32 %v275_v53  ;;  %v424_v53 = vld [vmem:[#allocation13 + $0x48] sm:$0xff] }
 0x2a2   :  { %438 = vmatpush.msra.mxu3 %v424_v53 }
 0x2a7   :  { %v510_v54 = vpop.eup %509 }
 0x2a8   :  { %v279_v55 = vperm.slane %v510_v54, 1  ;;  %v278_v56 = vperm.slane %v510_v54, 0  ;;  %v423_v54 = vld [vmem:[#allocation13 + $0x40] sm:$0xff] }
 0x2a9   :  { %439 = vmatpush.msra.mxu3 %v423_v54 }
 0x2aa   :  { %v283_v57 = vmul.f32 %v508_v46, %v279_v55  ;;  %v282_v58 = vmul.f32 %v506_v45, %v278_v56  ;;  %v422_v55 = vld [vmem:[#allocation13 + $0x38] sm:$0xff]  ;;  %v421_v56 = vld [vmem:[#allocation13 + $0x30] sm:$0xff] }
 0x2ab   :  { %440 = vmatpush.msra.mxu3 %v422_v55 }
 0x2ac   :  { %291 = vperm.xlu1 %494, %v283_v57   ;;  %286 = vperm.xlu0 %496, %v282_v58   ;;  %v420_v57 = vld [vmem:[#allocation13 + $0x28] sm:$0xff] }
 0x2ad   :  { %441 = vmatpush.msra.mxu3 %v421_v56 }
 0x2af   :  { %442 = vmatpush.msra.mxu3 %v420_v57 }
 0x2b1   :  { %443 = vmatpush.msra.mxu3 %v419_v60 }
 0x2b3   :  { %444 = vmatpush.msra.mxu3 %v418_v61 }
 0x2b4   :  { %381 = vrot.lane.b32.xlu0 %v834_v9, %s731_s5 }
 0x2b5   :  { %445 = vmatpush.msra.mxu3 %v417_v62 }
 0x2b7   :  { %446 = vmatpush.msra.mxu3 %v416_v63 }
 0x31e   :  { %v292_v0 = vpop.permute.xlu1 %291  ;;  %v287_v1 = vpop.permute.xlu0 %286 }
 0x31f   :  { %v295_v2 = vmul.f32 %v292_v0, %v840_v10  ;;  %v294_v3 = vmul.f32 %v287_v1, %v832_v8  ;;  %v327_v10 = vld [vmem:[#allocation11 + $0x20] sm:$0xff]  ;;  %v415_v0 = vld [vmem:[#allocation13] sm:$0xff] }
 0x320   :  { %352 = vmatpush.msra.mxu2 %v327_v10  ;;  %447 = vmatpush.msra.mxu3 %v415_v0 }
 0x321   :  { %v303_v4 = vsel %vm152_vm0, %v295_v2, 0.0  ;;  %v296_v5 = vsel %vm152_vm0, %v294_v3, 0.0 }
 0x322   :  { %v304_v6 = vrot.slane %v303_v4, 4  ;;  %v297_v7 = vrot.slane %v296_v5, 4  ;;  %353 = vmatpush.msra.mxu2 %v326_v21 }
 0x324   :  { %v305_v11 = vadd.f32 %v304_v6, %v303_v4  ;;  %v298_v12 = vadd.f32 %v297_v7, %v296_v5  ;;  %354 = vmatpush.msra.mxu2 %v325_v22  ;;  %v500_v6 = vld [vmem:[%s892_s10] ss:$0 sm:$0xff] }
 0x326   :  { %v306_v13 = vrot.slane %v305_v11, 2  ;;  %v299_v14 = vrot.slane %v298_v12, 2  ;;  %355 = vmatpush.msra.mxu2 %v324_v23  ;;  %v382_v48 = vpop.permute.xlu0 %381 }
 0x328   :  { %v307_v15 = vadd.f32 %v306_v13, %v305_v11  ;;  %v300_v16 = vadd.f32 %v299_v14, %v298_v12  ;;  %356 = vmatpush.msra.mxu2 %v323_v24 }
 0x32a   :  { %v308_v17 = vrot.slane %v307_v15, 1  ;;  %v301_v18 = vrot.slane %v300_v16, 1 }
 0x32c   :  { %v302_v19 = vadd.f32 %v301_v18, %v300_v16  ;;  %v309_v20 = vadd.f32 %v308_v17, %v307_v15 }
 0x32e   :  { %v312_v8 = vsel %vm243_vm1, %v309_v20, %v302_v19 }
 0x32f   :  { %313 = vrot.lane.b32.xlu1 %v312_v8, %s732_s6 }
 0x337   :  { %316 = vrot.lane.b32.xlu1 %v834_v9, %s733_s12  ;;  %v499_v9 = vld [vmem:[%s890_s8] ss:$0 sm:$0xff] }
 0x3a1   :  { %v314_v25 = vpop.permute.xlu1 %313 }
 0x3a2   :  { %v320_v27 = vsel %vm319_vm3, %v144_v26, %v314_v25 }
 0x3a9   :  { %v317_v28 = vpop.permute.xlu1 %316 }
 0x3aa   :  { %v322_v29 = vsel %vm321_vm4, %v320_v27, %v317_v28 }
 0x3ab   :  { %476 = vmatmul.msk.f32.vlgmr.msra.gmra.mxu2 %vm337_vm5, %v322_v29 }
 0x42e   :  { %v358_v30 = vpop.f32.mrf.mxu2 }
 0x42f   :  { %v359_v31 = vadd.f32 %v499_v9, %v358_v30 }
 0x431   :  { %511 = vtanh.f32 %v359_v31  ;;  %v477_v33 = vmul.f32 -1.442695, %v359_v31 }
 0x433   :  { %513 = vpow2.f32 %v477_v33 }
 0x437   :  { %v512_v32 = vpop.eup %511 }
 0x438   :  { %386 = vrot.lane.b32.xlu2 %v512_v32, %s734_s3 }
 0x439   :  { %v514_v34 = vpop.eup %513 }
 0x43a   :  { %v364_v35 = vadd.f32 1.0, %v514_v34 }
 0x43c   :  { %515 = vrcp.f32 %v364_v35  ;;  %v376_v41 = vand.u32 2147483648, %v364_v35  ;;  %vm370_vm7 = vweird.f32 %v364_v35  ;;  %v374_v42 = vand.u32 2147483647, %v364_v35 }
 0x43e   :  { %v377_v44 = vor.u32 1.1754944e-38, %v376_v41  ;;  %vm375_vm9 = vcmp.eq.f32.partialorder %v374_v42, 8.507059e+37 }
 0x442   :  { %v516_v36 = vpop.eup %515 }
 0x443   :  { %v366_v37 = vmul.f32 %v516_v36, %v364_v35  ;;  %vm371_vm6 = vweird.f32 %v516_v36 }
 0x444   :  { %vm372_vm8 = vmor %vm370_vm7, %vm371_vm6 }
 0x445   :  { %v367_v38 = vsub.f32 1.0, %v366_v37 }
 0x447   :  { %v368_v39 = vmul.f32 %v516_v36, %v367_v38 }
 0x449   :  { %v369_v40 = vadd.f32 %v516_v36, %v368_v39 }
 0x44b   :  { %v373_v43 = vsel %vm372_vm8, %v516_v36, %v369_v40 }
 0x44c   :  { %v378_v45 = vsel %vm375_vm9, %v377_v44, %v373_v43 }
 0x44d   :  { %v384_v49 = vmul.f32 %v382_v48, %v378_v45 }
 0x492   :  { %v387_v46 = vpop.permute.xlu2 %386 }
 0x493   :  { %v389_v47 = vmul.f32 %v387_v46, %v378_v45 }
 0x495   :  { %391 = vrot.lane.b32.xlu1 %v389_v47, %s731_s5 }
 0x507   :  { %v392_v50 = vpop.permute.xlu1 %391 }
 0x508   :  { %v394_v51 = vadd.f32 %v392_v50, %v384_v49 }
 0x50a   :  { %517 = vtanh.f32 %v394_v51 }
 0x510   :  { %v518_v52 = vpop.eup %517 }
 0x511   :  { %397 = vrot.lane.b32.xlu0 %v518_v52, %s734_s3 }
 0x519   :  { %405 = vrot.lane.b32.xlu0 %v312_v8, %s731_s5 }
 0x583   :  { %v398_v58 = vpop.permute.xlu0 %397 }
 0x584   :  { %v400_v59 = vmul.f32 %v398_v58, %v378_v45 }
 0x586   :  { %402 = vrot.lane.b32.xlu1 %v400_v59, %s731_s5 }
 0x58b   :  { %v406_v2 = vpop.permute.xlu0 %405 }
 0x58e   :  { %409 = vrot.lane.b32.xlu1 %v144_v26, %s734_s3 }
 0x5f8   :  { %v403_v1 = vpop.permute.xlu1 %402 }
 0x5f9   :  { %v412_v3 = vsel %vm152_vm0, %v403_v1, %v406_v2 }
 0x600   :  { %v410_v4 = vpop.permute.xlu1 %409 }
 0x601   :  { %v414_v5 = vsel %vm413_vm10, %v412_v3, %v410_v4 }
 0x602   :  { %478 = vmatmul.msk.f32.vlgmr.msra.gmra.mxu3 %vm337_vm5, %v414_v5 }
 0x685   :  { %v449_v7 = vpop.f32.mrf.mxu3 }
 0x686   :  { %v450_v11 = vadd.f32 %v500_v6, %v449_v7 }
 0x688   :  { %452 = vst [vmem:[#allocation14] sm:$0x3] %v450_v11 }
 0x689   :  { %463 = dma.vmem_to_hbm [thread:$0]  %s459_s16, 32, %s461_s19, [#allocation4]  }
 0x68a   :  { %719 = dma.done.wait [#allocation4], 32  }
 0x68b   :  { %720 = vsyncadd [#allocation4], 4294967264 }
 0x68c   :  { %468 = vsyncpa [#allocation3], 1 }
 0x68d   :  { %469 = vsyncpa [#allocation6], 1 }
 0x68e   :  { %470 = vsyncpa [#allocation9], 1 }
 0x68f   :  { %471 = vsyncpa [#allocation12], 1 }
 0x690   :  { %472 = vsyncpa [#allocation4], 1 }

</bundles_post_ra>
